<compile_context>
chip_gen: v5e
topology: v5e:2x2
jax: 0.10.0
libtpu: 0.0.40
codegen_flags: <defaults>
</compile_context>

<pallas_src>
import functools

import jax
import jax.numpy as jnp
from jax import lax
from jax.experimental import pallas as pl
from jax.experimental.pallas import tpu as pltpu

MARGIN = 1.0
EPS = 1e-6  # PyTorch pairwise_distance eps (added to the difference before the norm)


def _plain_kernel(a_ref, p_ref, n_ref, loss_ref, *, margin):
    """Per-row triplet hinge loss, operands laid out as (tile_rows, D)."""
    a = a_ref[...].astype(jnp.float32)
    p = p_ref[...].astype(jnp.float32)
    n = n_ref[...].astype(jnp.float32)

    # d(x, y) = || x - y + eps ||_2 per row (PyTorch pairwise_distance semantics).
    dp = jnp.sqrt(jnp.sum((a - p + EPS) ** 2, axis=-1, keepdims=True))  # (tn, 1)
    dn = jnp.sqrt(jnp.sum((a - n + EPS) ** 2, axis=-1, keepdims=True))  # (tn, 1)

    loss_ref[...] = jnp.maximum(dp - dn + margin, 0.0)                  # (tn, 1)


def _packed_kernel(a_ref, p_ref, n_ref, s_ref, loss_ref, *, margin):
    """Lane-dense path: operands are (tile_rows, 128) holding R=128/D original rows
    per packed row; s_ref is a (128, R) 0/1 segment-indicator matrix so the per-row
    squared-distance reduction is a tiny MXU matmul instead of a 25%-occupancy VPU op."""
    a = a_ref[...].astype(jnp.float32)
    p = p_ref[...].astype(jnp.float32)
    n = n_ref[...].astype(jnp.float32)
    s = s_ref[...]                                                       # (128, R)

    sq_p = (a - p + EPS) ** 2                                            # (tp, 128)
    sq_n = (a - n + EPS) ** 2                                            # (tp, 128)

    dp2 = jnp.dot(sq_p, s, precision=lax.Precision.HIGHEST,
                  preferred_element_type=jnp.float32)                    # (tp, R)
    dn2 = jnp.dot(sq_n, s, precision=lax.Precision.HIGHEST,
                  preferred_element_type=jnp.float32)                    # (tp, R)

    loss_ref[...] = jnp.maximum(jnp.sqrt(dp2) - jnp.sqrt(dn2) + margin, 0.0)


def triplet_loss(anchor, positive, negative, *, margin=MARGIN, tile_rows=None,
                 target_tile_bytes=4 * 1024 * 1024):
    """Pallas TPU triplet margin loss. Inputs: (N, D) f32 or bf16. Returns scalar f32."""
    N, D = anchor.shape
    assert positive.shape == (N, D) and negative.shape == (N, D)

    itemsize = jnp.dtype(anchor.dtype).itemsize
    sub = max(8, 32 // itemsize)  # sublane packing multiple: 8 (f32), 16 (bf16), 32 (i8)

    # Lane-dense repacking when D is a small divisor of 128 (pure reshape/view).
    use_packed = (D % 128 != 0) and (128 % D == 0) and ((N * D) % 128 == 0)
    if use_packed:
        R = 128 // D                       # original rows per packed row
        rows, cols = (N * D) // 128, 128
        a = anchor.reshape(rows, cols)
        p = positive.reshape(rows, cols)
        n = negative.reshape(rows, cols)
    else:
        R = 1
        rows, cols = N, D
        a, p, n = anchor, positive, negative

    # Tile by bytes (~4 MiB per input tile), aligned to the dtype's sublane multiple.
    row_bytes = cols * itemsize
    if tile_rows is None:
        tn = max(1, target_tile_bytes // row_bytes)
    else:
        tn = int(tile_rows)
    if tn >= rows:
        tn = rows                          # single tile: block == full dims
    else:
        tn = max(sub, (tn // sub) * sub)   # sublane-aligned when tiling the batch

    num_tiles = int(pl.cdiv(rows, tn))
    in_spec = pl.BlockSpec((tn, cols), lambda i: (i, 0))

    if use_packed:
        seg = (jnp.arange(128, dtype=jnp.int32)[:, None] // D
               == jnp.arange(R, dtype=jnp.int32)[None, :]).astype(jnp.float32)
        kernel = functools.partial(_packed_kernel, margin=float(margin))
        in_specs = [in_spec, in_spec, in_spec,
                    pl.BlockSpec((128, R), lambda i: (0, 0))]
        operands = (a, p, n, seg)
        out_shape = jax.ShapeDtypeStruct((rows, R), jnp.float32)
        out_spec = pl.BlockSpec((tn, R), lambda i: (i, 0))
    else:
        kernel = functools.partial(_plain_kernel, margin=float(margin))
        in_specs = [in_spec, in_spec, in_spec]
        operands = (a, p, n)
        out_shape = jax.ShapeDtypeStruct((rows, 1), jnp.float32)
        out_spec = pl.BlockSpec((tn, 1), lambda i: (i, 0))

    losses = pl.pallas_call(
        kernel,
        out_shape=out_shape,
        grid_spec=pltpu.PrefetchScalarGridSpec(
            num_scalar_prefetch=0,
            grid=(num_tiles,),
            in_specs=in_specs,
            out_specs=out_spec,
        ),
        compiler_params=pltpu.CompilerParams(
            # No carried accumulator -> batch tiles are independent; lets Mosaic
            # shard the grid across both TensorCores on v7x.
            dimension_semantics=("parallel",),
            vmem_limit_bytes=48 * 1024 * 1024,
        ),
    )(*operands)

    # Tiny final reduce + mean in XLA (output is N*4 bytes -- negligible HBM traffic).
    return jnp.sum(losses) / jnp.float32(N)


def _reference(anchor, positive, negative, margin=MARGIN):
    a = anchor.astype(jnp.float32)
    p = positive.astype(jnp.float32)
    n = negative.astype(jnp.float32)
    dp = jnp.sqrt(jnp.sum((a - p + EPS) ** 2, axis=-1))
    dn = jnp.sqrt(jnp.sum((a - n + EPS) ** 2, axis=-1))
    return jnp.mean(jnp.maximum(dp - dn + margin, 0.0))


if __name__ == "__main__":
    key = jax.random.PRNGKey(0)
    ks = jax.random.split(key, 9)

    def l2norm(x):
        return x / jnp.linalg.norm(x, axis=-1, keepdims=True)

    # Case 1: module-faithful embeddings (FeatureExtractor -> 512-d L2-normalized rows),
    # f32, single tile, D % 128 == 0 (already lane-dense).
    N1, D1 = 8, 512
    a1 = l2norm(jax.random.normal(ks[0], (N1, D1), dtype=jnp.float32))
    p1 = l2norm(jax.random.normal(ks[1], (N1, D1), dtype=jnp.float32))
    n1 = l2norm(jax.random.normal(ks[2], (N1, D1), dtype=jnp.float32))
    out1 = triplet_loss(a1, p1, n1)
    jax.block_until_ready(out1)
    ref1 = _reference(a1, p1, n1)
    assert jnp.allclose(out1, ref1, rtol=1e-5, atol=1e-5), (out1, ref1)

    # Case 2: small-D embeddings -> lane-dense packed path with a multi-step grid
    # (N*D/128 = 256 packed rows, tile_rows=64 -> 4 grid steps), segment-matmul reduce.
    N2, D2 = 1024, 32
    a2 = jax.random.normal(ks[3], (N2, D2), dtype=jnp.float32)
    p2 = jax.random.normal(ks[4], (N2, D2), dtype=jnp.float32)
    n2 = jax.random.normal(ks[5], (N2, D2), dtype=jnp.float32)
    out2 = triplet_loss(a2, p2, n2, tile_rows=64)
    jax.block_until_ready(out2)
    ref2 = _reference(a2, p2, n2)
    assert jnp.allclose(out2, ref2, rtol=1e-4, atol=1e-5), (out2, ref2)

    # Case 3: bf16 inputs (half the HBM traffic), ragged batch, tiled plain path
    # (tile_rows rounded to the bf16 sublane multiple of 16 -> 2 grid steps, ragged tail).
    N3, D3 = 20, 256
    a3 = jax.random.normal(ks[6], (N3, D3), dtype=jnp.float32).astype(jnp.bfloat16)
    p3 = jax.random.normal(ks[7], (N3, D3), dtype=jnp.float32).astype(jnp.bfloat16)
    n3 = jax.random.normal(ks[8], (N3, D3), dtype=jnp.float32).astype(jnp.bfloat16)
    out3 = triplet_loss(a3, p3, n3, tile_rows=16)
    jax.block_until_ready(out3)
    ref3 = _reference(a3, p3, n3)  # reference upcasts bf16 the same way
    assert jnp.allclose(out3, ref3, rtol=1e-4, atol=1e-4), (out3, ref3)

    print("KERNEL_OK")
</pallas_src>

<mosaic_0001>
module attributes {stable_mosaic.version = 11 : i64} {
  func.func @_plain_kernel(%arg0: i32, %arg1: memref<8x512xf32, #tpu.memory_space<vmem>>, %arg2: memref<8x512xf32, #tpu.memory_space<vmem>>, %arg3: memref<8x512xf32, #tpu.memory_space<vmem>>, %arg4: memref<8x1xf32, #tpu.memory_space<vmem>>) attributes {dimension_semantics = [#tpu.dimension_semantics<parallel>], iteration_bounds = array<i64: 1>, scalar_prefetch = 0 : i64, scratch_operands = 0 : i64, tpu.core_type = #tpu.core_type<tc>, window_params = [{transform_indices = @transform_0, window_bounds = array<i64: 8, 512>}, {transform_indices = @transform_1, window_bounds = array<i64: 8, 512>}, {transform_indices = @transform_2, window_bounds = array<i64: 8, 512>}, {transform_indices = @transform_3, window_bounds = array<i64: 8, 1>}]} {
    %c0 = arith.constant 0 : index
    %c0_0 = arith.constant 0 : index
    %0 = vector.load %arg1[%c0, %c0_0] : memref<8x512xf32, #tpu.memory_space<vmem>>, vector<8x512xf32>
    %c0_1 = arith.constant 0 : index
    %c0_2 = arith.constant 0 : index
    %1 = vector.load %arg2[%c0_1, %c0_2] : memref<8x512xf32, #tpu.memory_space<vmem>>, vector<8x512xf32>
    %c0_3 = arith.constant 0 : index
    %c0_4 = arith.constant 0 : index
    %2 = vector.load %arg3[%c0_3, %c0_4] : memref<8x512xf32, #tpu.memory_space<vmem>>, vector<8x512xf32>
    %3 = arith.subf %0, %1 : vector<8x512xf32>
    %cst = arith.constant 9.99999997E-7 : f32
    %4 = vector.broadcast %cst : f32 to vector<8x512xf32>
    %5 = arith.addf %3, %4 : vector<8x512xf32>
    %6 = arith.mulf %5, %5 : vector<8x512xf32>
    %cst_5 = arith.constant dense<0.000000e+00> : vector<8xf32>
    %7 = vector.multi_reduction <add>, %6, %cst_5 [1] : vector<8x512xf32> to vector<8xf32>
    %8 = vector.shape_cast %7 : vector<8xf32> to vector<8x1xf32>
    %9 = math.sqrt %8 : vector<8x1xf32>
    %10 = arith.subf %0, %2 : vector<8x512xf32>
    %cst_6 = arith.constant 9.99999997E-7 : f32
    %11 = vector.broadcast %cst_6 : f32 to vector<8x512xf32>
    %12 = arith.addf %10, %11 : vector<8x512xf32>
    %13 = arith.mulf %12, %12 : vector<8x512xf32>
    %cst_7 = arith.constant dense<0.000000e+00> : vector<8xf32>
    %14 = vector.multi_reduction <add>, %13, %cst_7 [1] : vector<8x512xf32> to vector<8xf32>
    %15 = vector.shape_cast %14 : vector<8xf32> to vector<8x1xf32>
    %16 = math.sqrt %15 : vector<8x1xf32>
    %17 = arith.subf %9, %16 : vector<8x1xf32>
    %cst_8 = arith.constant 1.000000e+00 : f32
    %18 = vector.broadcast %cst_8 : f32 to vector<8x1xf32>
    %19 = arith.addf %17, %18 : vector<8x1xf32>
    %cst_9 = arith.constant 0.000000e+00 : f32
    %20 = vector.broadcast %cst_9 : f32 to vector<8x1xf32>
    %21 = arith.maximumf %19, %20 : vector<8x1xf32>
    %c0_10 = arith.constant 0 : index
    %c0_11 = arith.constant 0 : index
    %22 = vector.load %arg4[%c0_10, %c0_11] : memref<8x1xf32, #tpu.memory_space<vmem>>, vector<8x1xf32>
    tpu.vector_store %arg4[%c0_10, %c0_11], %21 {strides = array<i32>} : memref<8x1xf32, #tpu.memory_space<vmem>>, vector<8x1xf32>,
    return
  }
  func.func @transform_0(%arg0: i32) -> (i32, i32) {
    %c0_i32 = arith.constant 0 : i32
    %c0_i32_0 = arith.constant 0 : i32
    return %arg0, %c0_i32 : i32, i32
  }
  func.func @transform_1(%arg0: i32) -> (i32, i32) {
    %c0_i32 = arith.constant 0 : i32
    %c0_i32_0 = arith.constant 0 : i32
    return %arg0, %c0_i32 : i32, i32
  }
  func.func @transform_2(%arg0: i32) -> (i32, i32) {
    %c0_i32 = arith.constant 0 : i32
    %c0_i32_0 = arith.constant 0 : i32
    return %arg0, %c0_i32 : i32, i32
  }
  func.func @transform_3(%arg0: i32) -> (i32, i32) {
    %c0_i32 = arith.constant 0 : i32
    %c0_i32_0 = arith.constant 0 : i32
    return %arg0, %c0_i32 : i32, i32
  }
}

</mosaic_0001>

<bundles_post_ra>
// kernel: tpu_custom_call.1
= control target key start
LH: loop header
LB: loop body
LE: loop exit
PB: predicated region body
PF: predicated region fallthrough
CT: control target
= control target key end

     0   :  { %8 = vsyncpa [#allocation3], 0  ;;  %s254_s0 = inlined_call_operand.hbm [shape: f32[8,512], index: 0, kind: input, shape index: {}]   ;;  %s255_s1 = inlined_call_operand.hbm [shape: f32[8,512], index: 1, kind: input, shape index: {}]   ;;  %s256_s2 = inlined_call_operand.hbm [shape: f32[8,512], index: 2, kind: input, shape index: {}]   ;;  %s257_s3 = inlined_call_operand.vmem [shape: f32[8,1], index: 3, kind: output, shape index: {}]  }
   0x1   :  { %9 = vsyncpa [#allocation5], 0  ;;  %s26_s14 = sshll.u32 %s255_s1, 4  ;;  %s219_s15 = smov [#allocation4]   ;;  %s27_s14 = int_to_ptr.hbm [resolvable:$true] %s26_s14 }
   0x2   :  { %s28_s16 = sshll.u32 %s219_s15, 4  ;;  %s15_s19 = sshll.u32 %s254_s0, 4  ;;  %s29_s16 = int_to_ptr.vmem [resolvable:$true] %s28_s16  ;;  %s16_s19 = int_to_ptr.hbm [resolvable:$true] %s15_s19 }
   0x3   :  { %31 = dma.hbm_to_vmem [thread:$0]  %s27_s14, 512, %s29_s16, [#allocation5]  }
   0x4   :  { %s220_s20 = smov [#allocation2]   ;;  %s37_s24 = sshll.u32 %s256_s2, 4  ;;  %s38_s24 = int_to_ptr.hbm [resolvable:$true] %s37_s24 }
   0x5   :  { %s17_s21 = sshll.u32 %s220_s20, 4  ;;  %s221_s1 = smov [#allocation6]   ;;  %s18_s21 = int_to_ptr.vmem [resolvable:$true] %s17_s21 }
   0x6   :  { %20 = dma.hbm_to_vmem [thread:$0]  %s16_s19, 512, %s18_s21, [#allocation3]  }
   0x7   :  { %s39_s25 = sshll.u32 %s221_s1, 4  ;;  %s40_s25 = int_to_ptr.vmem [resolvable:$true] %s39_s25 }
   0x8   :  { %42 = dma.hbm_to_vmem [thread:$0]  %s38_s24, 512, %s40_s25, [#allocation5]  }
   0x9   :  { %215 = dma.done.wait [#allocation3], 512  }
   0xa   :  { %216 = vsyncadd [#allocation3], 4294966784 }
   0xb   :  { %217 = dma.done.wait [#allocation5], 1024  }
   0xc   :  { %218 = vsyncadd [#allocation5], 4294966272  ;;  %v55_v0 = vld [vmem:[#allocation2] sm:$0xff]  ;;  %v56_v1 = vld [vmem:[#allocation2 + $0x8] sm:$0xff]  ;;  %vm128_vm4 = vcmask 7168  }
   0xd   :  { %v57_v2 = vld [vmem:[#allocation2 + $0x10] sm:$0xff]  ;;  %v58_v3 = vld [vmem:[#allocation2 + $0x18] sm:$0xff]  ;;  %v59_v4 = vld [vmem:[#allocation4] sm:$0xff] }
   0xe   :  { %v60_v5 = vld [vmem:[#allocation4 + $0x8] sm:$0xff]  ;;  %v61_v6 = vld [vmem:[#allocation4 + $0x10] sm:$0xff]  ;;  %v62_v7 = vld [vmem:[#allocation4 + $0x18] sm:$0xff]  ;;  %v67_v8 = vsub.f32 %v55_v0, %v59_v4 }
   0xf   :  { %v68_v9 = vsub.f32 %v56_v1, %v60_v5  ;;  %v63_v10 = vld [vmem:[#allocation6] sm:$0xff]  ;;  %v69_v11 = vsub.f32 %v57_v2, %v61_v6  ;;  %v70_v12 = vsub.f32 %v58_v3, %v62_v7  ;;  %v64_v13 = vld [vmem:[#allocation6 + $0x8] sm:$0xff]  ;;  %v65_v14 = vld [vmem:[#allocation6 + $0x10] sm:$0xff] }
  0x10   :  { %v66_v15 = vld [vmem:[#allocation6 + $0x18] sm:$0xff]  ;;  %v96_v16 = vsub.f32 %v55_v0, %v63_v10  ;;  %v71_v17 = vadd.f32 1e-06, %v67_v8  ;;  %v97_v19 = vsub.f32 %v56_v1, %v64_v13  ;;  %v98_v20 = vsub.f32 %v57_v2, %v65_v14 }
  0x11   :  { %v72_v18 = vadd.f32 1e-06, %v68_v9  ;;  %v73_v21 = vadd.f32 1e-06, %v69_v11  ;;  %v74_v22 = vadd.f32 1e-06, %v70_v12  ;;  %v99_v23 = vsub.f32 %v58_v3, %v66_v15 }
  0x12   :  { %v100_v24 = vadd.f32 1e-06, %v96_v16  ;;  %v75_v25 = vmul.f32 %v71_v17, %v71_v17  ;;  %v101_v27 = vadd.f32 1e-06, %v97_v19  ;;  %v102_v28 = vadd.f32 1e-06, %v98_v20 }
  0x13   :  { %v76_v26 = vmul.f32 %v72_v18, %v72_v18  ;;  %v77_v29 = vmul.f32 %v73_v21, %v73_v21  ;;  %v78_v31 = vmul.f32 %v74_v22, %v74_v22  ;;  %v103_v35 = vadd.f32 1e-06, %v99_v23 }
  0x14   :  { %v104_v30 = vmul.f32 %v100_v24, %v100_v24  ;;  %v105_v33 = vmul.f32 %v101_v27, %v101_v27  ;;  %v106_v36 = vmul.f32 %v102_v28, %v102_v28 }
  0x15   :  { %v79_v32 = vadd.f32 %v76_v26, %v75_v25  ;;  %v107_v39 = vmul.f32 %v103_v35, %v103_v35 }
  0x16   :  { %v108_v37 = vadd.f32 %v105_v33, %v104_v30 }
  0x17   :  { %v80_v34 = vadd.f32 %v79_v32, %v77_v29 }
  0x18   :  { %v109_v40 = vadd.f32 %v108_v37, %v106_v36 }
  0x19   :  { %v81_v38 = vadd.f32 %v80_v34, %v78_v31 }
  0x1a   :  { %v110_v41 = vadd.f32 %v109_v40, %v107_v39 }
  0x1b   :  { %82 = vadd.xlane.f32.xlu0 %v81_v38 }
  0x23   :  { %111 = vadd.xlane.f32.xlu0 %v110_v41 }
  0x8e   :  { %v83_v42 = vpop.xlane.xlu0 %82 }
  0x8f   :  { %139 = vrsqrt.f32 %v83_v42  ;;  %vm91_vm0 = vcmp.eq.f32.partialorder %v83_v42, inf  ;;  %v94_v59 = vand.u32 2147483648, %v83_v42  ;;  %vm93_vm2 = vcmp.eq.f32.partialorder %v83_v42, 0.0 }
  0x95   :  { %v140_v43 = vpop.eup %139 }
  0x96   :  { %v85_v44 = vmul.f32 %v140_v43, %v83_v42  ;;  %v112_v45 = vpop.xlane.xlu0 %111 }
  0x97   :  { %141 = vrsqrt.f32 %v112_v45  ;;  %vm120_vm1 = vcmp.eq.f32.partialorder %v112_v45, inf  ;;  %v123_v60 = vand.u32 2147483648, %v112_v45  ;;  %vm122_vm3 = vcmp.eq.f32.partialorder %v112_v45, 0.0 }
  0x98   :  { %v86_v46 = vmul.f32 %v140_v43, %v85_v44 }
  0x9a   :  { %v87_v47 = vmul.f32 0.5, %v86_v46 }
  0x9c   :  { %v88_v48 = vsub.f32 1.5, %v87_v47 }
  0x9d   :  { %v142_v49 = vpop.eup %141 }
  0x9e   :  { %v114_v50 = vmul.f32 %v142_v49, %v112_v45  ;;  %v89_v51 = vmul.f32 %v140_v43, %v88_v48 }
  0xa0   :  { %v115_v52 = vmul.f32 %v142_v49, %v114_v50  ;;  %v90_v54 = vmul.f32 %v89_v51, %v83_v42 }
  0xa2   :  { %v116_v53 = vmul.f32 0.5, %v115_v52  ;;  %v92_v57 = vsel %vm91_vm0, %v83_v42, %v90_v54 }
  0xa3   :  { %v95_v62 = vsel %vm93_vm2, %v94_v59, %v92_v57 }
  0xa4   :  { %v117_v55 = vsub.f32 1.5, %v116_v53 }
  0xa6   :  { %v118_v56 = vmul.f32 %v142_v49, %v117_v55 }
  0xa8   :  { %v119_v58 = vmul.f32 %v118_v56, %v112_v45 }
  0xaa   :  { %v121_v61 = vsel %vm120_vm1, %v112_v45, %v119_v58 }
  0xab   :  { %v124_v63 = vsel %vm122_vm3, %v123_v60, %v121_v61 }
  0xac   :  { %v125_v0 = vsub.f32 %v95_v62, %v124_v63 }
  0xae   :  { %v126_v1 = vadd.f32 1.0, %v125_v0 }
  0xb0   :  { %v127_v2 = vmax.f32 %v126_v1, 0.0 }
  0xb2   :  { %129 = vst.msk [vmem:[%s257_s3] sm:$0xff] %vm128_vm4, %v127_v2 }
  0xb3   :  { %134 = vsyncpa [#allocation3], 1 }
  0xb4   :  { %135 = vsyncpa [#allocation5], 1 }

</bundles_post_ra>
